<compile_context>
chip_gen: v7x
topology: tpu7x:2x2x1
jax: 0.10.0
libtpu: 0.0.40
codegen_flags: <defaults>
</compile_context>

<pallas_src>
import functools

import jax
import jax.numpy as jnp
from jax.experimental import pallas as pl
from jax.experimental.pallas import tpu as pltpu


def _round_up(x: int, m: int) -> int:
    return ((x + m - 1) // m) * m


def video_encoder_kernel(x_ref, wvis_ref, proj_ref, o_ref, acc_ref):
    """Grid = (M tiles, K tiles); K is the reduction axis (last, "arbitrary").

    x_ref   : (TM, TK)        f32 tile of flattened frame pixels (bf16-cast here)
    wvis_ref: (TK, D_vis)     bf16 tile of the stand-in visual embedding weight
    proj_ref: (D_vis, D_out)  bf16 CLIP projection (single-buffered, resident)
    o_ref   : (TM, D_out)     bf16 output tile, lane-dense (D_out last, 128-aligned)
    acc_ref : (TM, D_vis)     f32 VMEM accumulator for the visual features
    """
    k = pl.program_id(1)

    @pl.when(k == 0)
    def _():
        acc_ref[...] = jnp.zeros_like(acc_ref)

    # Visual stand-in: accumulate (TM, TK) @ (TK, D_vis) in f32.  The f32 -> bf16
    # cast of the pixel tile is VPU work hidden under the MXU.
    acc_ref[...] += jnp.dot(
        x_ref[...].astype(wvis_ref.dtype), wvis_ref[...],
        preferred_element_type=jnp.float32)

    @pl.when(k == pl.num_programs(1) - 1)
    def _():
        feats = acc_ref[...].astype(proj_ref.dtype)
        out = jnp.dot(feats, proj_ref[...], preferred_element_type=jnp.float32)
        o_ref[...] = out.astype(o_ref.dtype)


_VMEM_BUDGET = 40 * 1024 * 1024  # headroom under v7x's 64 MiB physical VMEM


def _vmem_bytes(tm, tk, d_vis_pad, d_out_pad):
    x_b = 2 * tm * tk * 4                  # f32 pixel tile, double-buffered
    w_b = 2 * tk * d_vis_pad * 2           # bf16 w_vis tile, double-buffered
    p_b = 1 * d_vis_pad * d_out_pad * 2    # bf16 clip_proj, Buffered(1)
    o_b = 2 * tm * d_out_pad * 2           # bf16 output tile, double-buffered
    a_b = tm * d_vis_pad * 4               # f32 accumulator scratch
    return x_b + w_b + p_b + o_b + a_b


@functools.partial(jax.jit, static_argnames=("num_frames",))
def video_encoder(x_frames, w_vis, clip_proj, *, num_frames):
    """x_frames: (B*T, C, H, W) float32.  Returns (B, D_out, T) float32."""
    bt, c, h, w = x_frames.shape
    assert bt % num_frames == 0
    b = bt // num_frames
    p = c * h * w
    d_vis = w_vis.shape[1]
    d_out = clip_proj.shape[1]

    compute_dtype = jnp.bfloat16

    # ---- lane-dense feature / output dims (multiple of 128, zero-padded) ----
    d_vis_pad = _round_up(d_vis, 128)
    d_out_pad = _round_up(d_out, 128)

    # ---- M tiling: TM >= 128, as large as useful, and grid_M >= 2 (v7x 2 TCs) ----
    if bt >= 1024:
        tm = 512
    elif bt >= 512:
        tm = 256
    else:
        tm = 128
    bt_pad = _round_up(bt, tm)
    if bt_pad // tm < 2:
        bt_pad = 2 * tm  # make sure the "parallel" axis feeds both TensorCores

    # ---- K tiling: big TK (amortize grid-step overhead), shrink to fit VMEM ----
    tk = min(2048, _round_up(p, 128))
    while _vmem_bytes(tm, tk, d_vis_pad, d_out_pad) > _VMEM_BUDGET and tk > 256:
        tk //= 2
    while _vmem_bytes(tm, tk, d_vis_pad, d_out_pad) > _VMEM_BUDGET and tm > 128:
        tm //= 2
        bt_pad = max(_round_up(bt, tm), 2 * tm)
    p_pad = _round_up(p, tk)

    # x stays f32: one fused reshape+pad, the bf16 cast happens inside the kernel.
    # Zero-padded K columns contribute 0 to the contraction; extra M rows are
    # sliced off after the call.
    x2d = x_frames.reshape(bt, p)
    if bt_pad != bt or p_pad != p:
        x2d = jnp.pad(x2d, ((0, bt_pad - bt), (0, p_pad - p)))

    # Weights: zero-pad to the lane-dense padded dims (extra rows/cols contribute 0).
    w_vis_c = jnp.pad(w_vis.astype(compute_dtype),
                      ((0, p_pad - p), (0, d_vis_pad - d_vis)))
    clip_proj_c = jnp.pad(clip_proj.astype(compute_dtype),
                          ((0, d_vis_pad - d_vis), (0, d_out_pad - d_out)))

    grid = (bt_pad // tm, p_pad // tk)

    out2d = pl.pallas_call(
        video_encoder_kernel,
        out_shape=jax.ShapeDtypeStruct((bt_pad, d_out_pad), compute_dtype),
        grid_spec=pltpu.PrefetchScalarGridSpec(
            num_scalar_prefetch=0,
            grid=grid,
            in_specs=[
                # (TM, TK) f32 tile of pixel rows
                pl.BlockSpec((tm, tk), lambda i, k: (i, k)),
                # (TK, D_vis) slab of the stand-in visual weight (streams over K)
                pl.BlockSpec((tk, d_vis_pad), lambda i, k: (k, 0)),
                # full CLIP projection: constant index map -> single-buffered
                pl.BlockSpec((d_vis_pad, d_out_pad), lambda i, k: (0, 0),
                             pipeline_mode=pl.Buffered(1)),
            ],
            # lane-dense output tile; index independent of K (accumulator pattern)
            out_specs=pl.BlockSpec((tm, d_out_pad), lambda i, k: (i, 0)),
            scratch_shapes=[pltpu.VMEM((tm, d_vis_pad), jnp.float32)],
        ),
        compiler_params=pltpu.CompilerParams(
            dimension_semantics=("parallel", "arbitrary"),
            vmem_limit_bytes=48 * 1024 * 1024,
        ),
    )(x2d, w_vis_c, clip_proj_c)

    # '(b t) d -> b d t' rearrange in plain JAX on the bf16 result (cheap layout op,
    # keeps the kernel's stores lane-dense), then back to f32 for downstream use.
    out2d = out2d[:bt, :d_out]
    out = out2d.reshape(b, num_frames, d_out)
    return jnp.transpose(out, (0, 2, 1)).astype(jnp.float32)


def reference(x_frames, w_vis, clip_proj, *, num_frames):
    """Pure-JAX reference mirroring the kernel's bf16-input / f32-accumulate path."""
    bt = x_frames.shape[0]
    b = bt // num_frames
    cd = jnp.bfloat16
    x2d = x_frames.reshape(bt, -1).astype(cd)
    feats = jnp.dot(x2d, w_vis.astype(cd), preferred_element_type=jnp.float32)
    out = jnp.dot(feats.astype(cd), clip_proj.astype(cd),
                  preferred_element_type=jnp.float32).astype(cd)  # (B*T, D_out) bf16
    out = out.reshape(b, num_frames, -1)                          # (B, T, D)
    return jnp.transpose(out, (0, 2, 1)).astype(jnp.float32)      # '(b t) d -> b d t'


if __name__ == "__main__":
    # small shapes consistent with the forward: batch=2, frames=8, NCHW frames 4x16x16
    B, T, C, H, W = 2, 8, 4, 16, 16
    D_VIS, D_OUT = 32, 32

    key = jax.random.PRNGKey(0)
    kx, kv, kp = jax.random.split(key, 3)
    x = jax.random.normal(kx, (B * T, C, H, W), dtype=jnp.float32)
    w_vis = jax.random.normal(kv, (C * H * W, D_VIS), dtype=jnp.float32) * 0.02
    clip_proj = jax.random.normal(kp, (D_VIS, D_OUT), dtype=jnp.float32) * 0.05

    out = video_encoder(x, w_vis, clip_proj, num_frames=T)
    out = jax.block_until_ready(out)

    ref = reference(x, w_vis, clip_proj, num_frames=T)
    assert out.shape == (B, D_OUT, T), out.shape
    assert jnp.allclose(out, ref, rtol=1e-2, atol=1e-2), "mismatch vs reference"

    print("KERNEL_OK")
</pallas_src>

<mosaic_0001>
module attributes {stable_mosaic.version = 11 : i64} {
  func.func @video_encoder_kernel(%arg0: i32, %arg1: i32, %arg2: memref<128x1024xf32, #tpu.memory_space<vmem>>, %arg3: memref<1024x128xbf16, #tpu.memory_space<vmem>>, %arg4: memref<128x128xbf16, #tpu.memory_space<vmem>>, %arg5: memref<128x128xbf16, #tpu.memory_space<vmem>>, %arg6: memref<128x128xf32, #tpu.memory_space<vmem>>) attributes {dimension_semantics = [#tpu.dimension_semantics<parallel>, #tpu.dimension_semantics<arbitrary>], iteration_bounds = array<i64: 2, 1>, scalar_prefetch = 0 : i64, scratch_operands = 1 : i64, tpu.core_type = #tpu.core_type<tc>, window_params = [{transform_indices = @transform_0, window_bounds = array<i64: 128, 1024>}, {transform_indices = @transform_1, window_bounds = array<i64: 1024, 128>}, {pipeline_mode = #tpu.pipeline_mode<synchronous>, transform_indices = @transform_2, window_bounds = array<i64: 128, 128>}, {transform_indices = @transform_3, window_bounds = array<i64: 128, 128>}]} {
    %c0_i32 = arith.constant 0 : i32
    %0 = arith.cmpi eq, %arg1, %c0_i32 : i32
    %1 = arith.extui %0 : i1 to i32
    %c0_i32_0 = arith.constant 0 : i32
    %2 = arith.cmpi ne, %1, %c0_i32_0 : i32
    scf.if %2 {
      %cst_10 = arith.constant 0.000000e+00 : f32
      %13 = vector.broadcast %cst_10 : f32 to vector<128x128xf32>
      %c0_11 = arith.constant 0 : index
      %c0_12 = arith.constant 0 : index
      %14 = vector.load %arg6[%c0_11, %c0_12] : memref<128x128xf32, #tpu.memory_space<vmem>>, vector<128x128xf32>
      tpu.vector_store %arg6[%c0_11, %c0_12], %13 {strides = array<i32>} : memref<128x128xf32, #tpu.memory_space<vmem>>, vector<128x128xf32>,
    } else {
    }
    %c0 = arith.constant 0 : index
    %c0_1 = arith.constant 0 : index
    %3 = vector.load %arg6[%c0, %c0_1] : memref<128x128xf32, #tpu.memory_space<vmem>>, vector<128x128xf32>
    %c0_2 = arith.constant 0 : index
    %c0_3 = arith.constant 0 : index
    %4 = vector.load %arg2[%c0_2, %c0_3] : memref<128x1024xf32, #tpu.memory_space<vmem>>, vector<128x1024xf32>
    %5 = arith.truncf %4 : vector<128x1024xf32> to vector<128x1024xbf16>
    %c0_4 = arith.constant 0 : index
    %c0_5 = arith.constant 0 : index
    %6 = vector.load %arg3[%c0_4, %c0_5] : memref<1024x128xbf16, #tpu.memory_space<vmem>>, vector<1024x128xbf16>
    %cst = arith.constant dense<0.000000e+00> : vector<128x128xf32>
    %7 = tpu.matmul %5, %6, %cst {dimension_numbers = #tpu.dot_dimension_numbers<[1], [0], [0], [1], [0, 0, 1, 1], [], []>} : vector<128x1024xbf16>, vector<1024x128xbf16>, vector<128x128xf32> -> vector<128x128xf32>
    %8 = arith.addf %3, %7 : vector<128x128xf32>
    %c0_6 = arith.constant 0 : index
    %c0_7 = arith.constant 0 : index
    %9 = vector.load %arg6[%c0_6, %c0_7] : memref<128x128xf32, #tpu.memory_space<vmem>>, vector<128x128xf32>
    tpu.vector_store %arg6[%c0_6, %c0_7], %8 {strides = array<i32>} : memref<128x128xf32, #tpu.memory_space<vmem>>, vector<128x128xf32>,
    %c0_i32_8 = arith.constant 0 : i32
    %10 = arith.cmpi eq, %arg1, %c0_i32_8 : i32
    %11 = arith.extui %10 : i1 to i32
    %c0_i32_9 = arith.constant 0 : i32
    %12 = arith.cmpi ne, %11, %c0_i32_9 : i32
    scf.if %12 {
      %c0_10 = arith.constant 0 : index
      %c0_11 = arith.constant 0 : index
      %13 = vector.load %arg6[%c0_10, %c0_11] : memref<128x128xf32, #tpu.memory_space<vmem>>, vector<128x128xf32>
      %14 = arith.truncf %13 : vector<128x128xf32> to vector<128x128xbf16>
      %c0_12 = arith.constant 0 : index
      %c0_13 = arith.constant 0 : index
      %15 = vector.load %arg4[%c0_12, %c0_13] : memref<128x128xbf16, #tpu.memory_space<vmem>>, vector<128x128xbf16>
      %cst_14 = arith.constant dense<0.000000e+00> : vector<128x128xf32>
      %16 = tpu.matmul %14, %15, %cst_14 {dimension_numbers = #tpu.dot_dimension_numbers<[1], [0], [0], [1], [0, 0, 1, 1], [], []>} : vector<128x128xbf16>, vector<128x128xbf16>, vector<128x128xf32> -> vector<128x128xf32>
      %17 = arith.truncf %16 : vector<128x128xf32> to vector<128x128xbf16>
      %c0_15 = arith.constant 0 : index
      %c0_16 = arith.constant 0 : index
      %18 = vector.load %arg5[%c0_15, %c0_16] : memref<128x128xbf16, #tpu.memory_space<vmem>>, vector<128x128xbf16>
      tpu.vector_store %arg5[%c0_15, %c0_16], %17 {strides = array<i32>} : memref<128x128xbf16, #tpu.memory_space<vmem>>, vector<128x128xbf16>,
    } else {
    }
    return
  }
  func.func @transform_0(%arg0: i32, %arg1: i32) -> (i32, i32) {
    %c0_i32 = arith.constant 0 : i32
    return %arg0, %arg1 : i32, i32
  }
  func.func @transform_1(%arg0: i32, %arg1: i32) -> (i32, i32) {
    %c0_i32 = arith.constant 0 : i32
    %c0_i32_0 = arith.constant 0 : i32
    return %arg1, %c0_i32 : i32, i32
  }
  func.func @transform_2(%arg0: i32, %arg1: i32) -> (i32, i32) {
    %c0_i32 = arith.constant 0 : i32
    %c0_i32_0 = arith.constant 0 : i32
    %c0_i32_1 = arith.constant 0 : i32
    return %c0_i32, %c0_i32_0 : i32, i32
  }
  func.func @transform_3(%arg0: i32, %arg1: i32) -> (i32, i32) {
    %c0_i32 = arith.constant 0 : i32
    %c0_i32_0 = arith.constant 0 : i32
    return %arg0, %c0_i32 : i32, i32
  }
}

</mosaic_0001>

<bundles_post_ra>
// kernel: video_encoder.1
= control target key start
LH: loop header
LB: loop body
LE: loop exit
PB: predicated region body
PF: predicated region fallthrough
CT: control target
= control target key end

     0   :  { %s2367_s12 = smov 0   ;;  %s2369_s13 = smov 0   ;;  %s2801_s0 = inlined_call_operand.vmem [shape: f32[256,1024], index: 0, kind: input, shape index: {}]   ;;  %s2802_s1 = inlined_call_operand.vmem [shape: bf16[1024,128], index: 1, kind: input, shape index: {}]   ;;  %s2803_s2 = inlined_call_operand.vmem [shape: bf16[128,128], index: 2, kind: input, shape index: {}]   ;;  %s2804_s3 = inlined_call_operand.vmem [shape: bf16[256,128], index: 3, kind: output, shape index: {}]  }
   0x1   :  { %s2371_s14 = smov 0  }
   0x2 LB: > { %s25_s15 = sadd.s32 1, %s2341_s13  ;;  %p1747_p0 = scmp.ge.s32.totalorder %s2345_s14, 1  ;;  %s2345_s14 = sphi %s2371_s14, %s13_s14   ;;  %s2341_s13 = sphi %s2369_s13, %s2806_s13   ;;  %s2337_s12 = sphi %s2367_s12, %s2805_s12  }
   0x3   : > { %p27_p1 = scmp.ge.s32.totalorder %s25_s15, 2  ;;  %p169_p2 = scmp.lt.s32.totalorder %s2345_s14, 3 }
   0x5   : > { %s2808_s15 = smov (%p27_p1, %s25_s15), 0  ;;  %p170_p3 = pnand %p1747_p0, %p169_p2 }
   0x6   : > { %v2251_v0 = vld [vmem:[%s2802_s1 + $0x40] sm:$0xff] (!%p170_p3)   ;;  %v2255_v4 = vld [vmem:[%s2802_s1 + $0x48] sm:$0xff] (!%p170_p3)   ;;  %v2259_v8 = vld [vmem:[%s2802_s1 + $0x50] sm:$0xff] (!%p170_p3)   ;;  %s1748_s25 = sshll.u32 (!%p170_p3), %s2337_s12, 4 }
   0x7   : > { %173 = sbr.rel (%p170_p3) target bundleno = 601 (0x259), region = 32  ;;  %v2252_v1 = vld [vmem:[%s2802_s1 + $0xc0] sm:$0xff] (!%p170_p3)   ;;  %1907 = vmatprep.subr.bf16.mxu0 (!%p170_p3), %v2251_v0  ;;  %v2256_v5 = vld [vmem:[%s2802_s1 + $0xc8] sm:$0xff] (!%p170_p3)   ;;  %v2260_v9 = vld [vmem:[%s2802_s1 + $0xd0] sm:$0xff] (!%p170_p3)   ;;  %p205_p4 = scmp.lt.s32.totalorder (!%p170_p3), %s1748_s25, 31 }
   0x8   : > { %v2253_v2 = vld [vmem:[%s2802_s1] sm:$0xff] (!%p170_p3)   ;;  %1971 = vmatprep.subr.bf16.mxu1 (!%p170_p3), %v2252_v1  ;;  %v2257_v6 = vld [vmem:[%s2802_s1 + $0x8] sm:$0xff] (!%p170_p3)   ;;  %v2261_v10 = vld [vmem:[%s2802_s1 + $0x10] sm:$0xff] (!%p170_p3)  }
   0x9   : > { %v2254_v3 = vld [vmem:[%s2802_s1 + $0x80] sm:$0xff] (!%p170_p3)   ;;  %1908 = vmatpush3.bf16.msra.mxu0 (!%p170_p3), %v2253_v2  ;;  %v2258_v7 = vld [vmem:[%s2802_s1 + $0x88] sm:$0xff] (!%p170_p3)   ;;  %v2262_v11 = vld [vmem:[%s2802_s1 + $0x90] sm:$0xff] (!%p170_p3)  }
   0xa   : > { %1972 = vmatpush3.bf16.msra.mxu1 (!%p170_p3), %v2254_v3  ;;  %1909 = vmatprep.subr.bf16.mxu0 (!%p170_p3), %v2255_v4  ;;  %v2263_v12 = vld [vmem:[%s2802_s1 + $0x58] sm:$0xff] (!%p170_p3)   ;;  %v2267_v16 = vld [vmem:[%s2802_s1 + $0x60] sm:$0xff] (!%p170_p3)   ;;  %v2271_v20 = vld [vmem:[%s2802_s1 + $0x68] sm:$0xff] (!%p170_p3)  }
   0xb   : > { %1973 = vmatprep.subr.bf16.mxu1 (!%p170_p3), %v2256_v5  ;;  %v2264_v13 = vld [vmem:[%s2802_s1 + $0xd8] sm:$0xff] (!%p170_p3)   ;;  %v2268_v17 = vld [vmem:[%s2802_s1 + $0xe0] sm:$0xff] (!%p170_p3)   ;;  %v2272_v21 = vld [vmem:[%s2802_s1 + $0xe8] sm:$0xff] (!%p170_p3)  }
   0xc   : > { %v2265_v14 = vld [vmem:[%s2802_s1 + $0x18] sm:$0xff] (!%p170_p3)   ;;  %v2269_v18 = vld [vmem:[%s2802_s1 + $0x20] sm:$0xff] (!%p170_p3)   ;;  %v2273_v22 = vld [vmem:[%s2802_s1 + $0x28] sm:$0xff] (!%p170_p3)  }
   0xd   : > { %1910 = vmatpush3.bf16.msra.mxu0 (!%p170_p3), %v2257_v6  ;;  %v2266_v15 = vld [vmem:[%s2802_s1 + $0x98] sm:$0xff] (!%p170_p3)   ;;  %v2270_v19 = vld [vmem:[%s2802_s1 + $0xa0] sm:$0xff] (!%p170_p3)   ;;  %v2274_v23 = vld [vmem:[%s2802_s1 + $0xa8] sm:$0xff] (!%p170_p3)  }
   0xe   : > { %1974 = vmatpush3.bf16.msra.mxu1 %v2258_v7  ;;  %1911 = vmatprep.subr.bf16.mxu0 %v2259_v8  ;;  %s2810_s25 = smov (!%p205_p4, %s1748_s25), 31  ;;  %v2275_v24 = vld [vmem:[%s2802_s1 + $0x70] sm:$0xff]   ;;  %v2279_v28 = vld [vmem:[%s2802_s1 + $0x78] sm:$0xff]   ;;  %v2283_v44 = vld [vmem:[%s2802_s1 + $0x140] sm:$0xff]  }
   0xf   : > { %1975 = vmatprep.subr.bf16.mxu1 %v2260_v9  ;;  %v2276_v25 = vld [vmem:[%s2802_s1 + $0xf0] sm:$0xff]   ;;  %s1843_s24 = sshll.u32 %s2810_s25, 6  ;;  %v2280_v29 = vld [vmem:[%s2802_s1 + $0xf8] sm:$0xff]   ;;  %v2284_v45 = vld [vmem:[%s2802_s1 + $0x100] sm:$0xff]   ;;  %s1752_s29 = sshll.u32 %s2810_s25, 2 }
  0x10   : > { %v2277_v26 = vld [vmem:[%s2802_s1 + $0x30] sm:$0xff]   ;;  %s2484_s12 = scalar_lea.vmem %s2801_s0, %s1843_s24  ;;  %v2281_v30 = vld [vmem:[%s2802_s1 + $0x38] sm:$0xff]   ;;  %v2285_v46 = vld [vmem:[%s2802_s1 + $0x1c0] sm:$0xff]   ;;  %s225_s5 = scalar_lea.vmem %s2804_s3, %s1752_s29 }
  0x11   : > { %1912 = vmatpush3.bf16.msra.mxu0 %v2261_v10  ;;  %v2278_v27 = vld [vmem:[%s2802_s1 + $0xb0] sm:$0xff]   ;;  %v2282_v31 = vld [vmem:[%s2802_s1 + $0xb8] sm:$0xff]   ;;  %v265_v32 = vld [vmem:[%s2484_s12 + $0x8] sm:$0xff] }
  0x12   : > { %1976 = vmatpush3.bf16.msra.mxu1 %v2262_v11  ;;  %1913 = vmatprep.subr.bf16.mxu0 %v2263_v12  ;;  %v273_v33 = vld [vmem:[%s2484_s12 + $0x48] sm:$0xff]  ;;  %v267_v34 = vld [vmem:[%s2484_s12 + $0x18] sm:$0xff]  ;;  %v264_v37 = vld [vmem:[%s2484_s12] sm:$0xff] }
  0x13   : > { %1977 = vmatprep.subr.bf16.mxu1 %v2264_v13  ;;  %v393_v35 = vpack.c.bf16 %v273_v33, %v265_v32  ;;  %v275_v36 = vld [vmem:[%s2484_s12 + $0x58] sm:$0xff]  ;;  %v272_v38 = vld [vmem:[%s2484_s12 + $0x40] sm:$0xff]  ;;  %v266_v41 = vld [vmem:[%s2484_s12 + $0x10] sm:$0xff] }
  0x14   : > { %v395_v39 = vpack.c.bf16 %v275_v36, %v267_v34  ;;  %v392_v40 = vpack.c.bf16 %v272_v38, %v264_v37  ;;  %v274_v42 = vld [vmem:[%s2484_s12 + $0x50] sm:$0xff]  ;;  %v2286_v47 = vld [vmem:[%s2802_s1 + $0x180] sm:$0xff]   ;;  %v281_v48 = vld [vmem:[%s2484_s12 + $0x88] sm:$0xff] }
  0x15   : > { %1914 = vmatpush3.bf16.msra.mxu0 %v2265_v14  ;;  %1000 = vmatprep.mubr.bf16.mxu0 %v393_v35  ;;  %v394_v43 = vpack.c.bf16 %v274_v42, %v266_v41  ;;  %v289_v49 = vld [vmem:[%s2484_s12 + $0xc8] sm:$0xff]  ;;  %v283_v50 = vld [vmem:[%s2484_s12 + $0x98] sm:$0xff]  ;;  %v280_v54 = vld [vmem:[%s2484_s12 + $0x80] sm:$0xff] }
  0x16   : > { %1978 = vmatpush3.bf16.msra.mxu1 %v2266_v15  ;;  %1915 = vmatprep.subr.bf16.mxu0 %v2267_v16  ;;  %v291_v51 = vld [vmem:[%s2484_s12 + $0xd8] sm:$0xff]  ;;  %v401_v52 = vpack.c.bf16 %v289_v49, %v281_v48  ;;  %v288_v55 = vld [vmem:[%s2484_s12 + $0xc0] sm:$0xff]  ;;  %v282_v56 = vld [vmem:[%s2484_s12 + $0x90] sm:$0xff] }
  0x17   : > { %1979 = vmatprep.subr.bf16.mxu1 %v2268_v17  ;;  %1097 = vmatprep.mubr.bf16.mxu1 %v395_v39  ;;  %v403_v53 = vpack.c.bf16 %v291_v51, %v283_v50  ;;  %v400_v57 = vpack.c.bf16 %v288_v55, %v280_v54  ;;  %v290_v58 = vld [vmem:[%s2484_s12 + $0xd0] sm:$0xff]  ;;  %v2287_v60 = vld [vmem:[%s2802_s1 + $0x148] sm:$0xff]   ;;  %v299_v3 = vld [vmem:[%s2484_s12 + $0x118] sm:$0xff] }
  0x18   : > { %v402_v59 = vpack.c.bf16 %v290_v58, %v282_v56  ;;  %v2288_v61 = vld [vmem:[%s2802_s1 + $0x108] sm:$0xff]   ;;  %v307_v4 = vld [vmem:[%s2484_s12 + $0x158] sm:$0xff]  ;;  %v296_v5 = vld [vmem:[%s2484_s12 + $0x100] sm:$0xff] }
  0x19   : > { %1916 = vmatpush3.bf16.msra.mxu0 %v2269_v18  ;;  %v2289_v62 = vld [vmem:[%s2802_s1 + $0x1c8] sm:$0xff]   ;;  %v411_v6 = vpack.c.bf16 %v307_v4, %v299_v3  ;;  %v304_v7 = vld [vmem:[%s2484_s12 + $0x140] sm:$0xff]  ;;  %v298_v8 = vld [vmem:[%s2484_s12 + $0x110] sm:$0xff] }
  0x1a   : > { %1980 = vmatpush3.bf16.msra.mxu1 %v2270_v19  ;;  %1917 = vmatprep.subr.bf16.mxu0 %v2271_v20  ;;  %v2290_v63 = vld [vmem:[%s2802_s1 + $0x188] sm:$0xff]   ;;  %v306_v9 = vld [vmem:[%s2484_s12 + $0x150] sm:$0xff]  ;;  %v408_v10 = vpack.c.bf16 %v304_v7, %v296_v5  ;;  %v315_v18 = vld [vmem:[%s2484_s12 + $0x198] sm:$0xff] }
  0x1b   : > { %1981 = vmatprep.subr.bf16.mxu1 %v2272_v21  ;;  %v297_v0 = vld [vmem:[%s2484_s12 + $0x108] sm:$0xff]  ;;  %v2291_v11 = vld [vmem:[%s2802_s1 + $0x150] sm:$0xff]   ;;  %v410_v12 = vpack.c.bf16 %v306_v9, %v298_v8  ;;  %v323_v20 = vld [vmem:[%s2484_s12 + $0x1d8] sm:$0xff] }
  0x1c   : > { %v305_v1 = vld [vmem:[%s2484_s12 + $0x148] sm:$0xff]  ;;  %v2292_v13 = vld [vmem:[%s2802_s1 + $0x110] sm:$0xff]   ;;  %v312_v21 = vld [vmem:[%s2484_s12 + $0x180] sm:$0xff] }
  0x1d   : > { %1918 = vmatpush3.bf16.msra.mxu0 %v2273_v22  ;;  %v409_v2 = vpack.c.bf16 %v305_v1, %v297_v0  ;;  %v2293_v14 = vld [vmem:[%s2802_s1 + $0x1d0] sm:$0xff]   ;;  %v313_v16 = vld [vmem:[%s2484_s12 + $0x188] sm:$0xff]  ;;  %v320_v22 = vld [vmem:[%s2484_s12 + $0x1c0] sm:$0xff] }
  0x1e   : > { %1982 = vmatpush3.bf16.msra.mxu1 %v2274_v23  ;;  %1919 = vmatprep.subr.bf16.mxu0 %v2275_v24  ;;  %v2294_v15 = vld [vmem:[%s2802_s1 + $0x190] sm:$0xff]   ;;  %v321_v17 = vld [vmem:[%s2484_s12 + $0x1c8] sm:$0xff]  ;;  %v419_v23 = vpack.c.bf16 %v323_v20, %v315_v18  ;;  %v331_v34 = vld [vmem:[%s2484_s12 + $0x218] sm:$0xff] }
  0x1f   : > { %1983 = vmatprep.subr.bf16.mxu1 %v2276_v25  ;;  %v417_v19 = vpack.c.bf16 %v321_v17, %v313_v16  ;;  %v314_v24 = vld [vmem:[%s2484_s12 + $0x190] sm:$0xff]  ;;  %v329_v32 = vld [vmem:[%s2484_s12 + $0x208] sm:$0xff]  ;;  %v339_v35 = vld [vmem:[%s2484_s12 + $0x258] sm:$0xff] }
  0x20   : > { %v322_v25 = vld [vmem:[%s2484_s12 + $0x1d0] sm:$0xff]  ;;  %v337_v33 = vld [vmem:[%s2484_s12 + $0x248] sm:$0xff]  ;;  %v427_v37 = vpack.c.bf16 %v339_v35, %v331_v34  ;;  %v328_v38 = vld [vmem:[%s2484_s12 + $0x200] sm:$0xff] }
  0x21   : > { %1920 = vmatpush3.bf16.msra.mxu0 %v2277_v26  ;;  %v2295_v26 = vld [vmem:[%s2802_s1 + $0x158] sm:$0xff]   ;;  %v425_v36 = vpack.c.bf16 %v337_v33, %v329_v32  ;;  %v336_v39 = vld [vmem:[%s2484_s12 + $0x240] sm:$0xff]  ;;  %v338_v41 = vld [vmem:[%s2484_s12 + $0x250] sm:$0xff] }
  0x22   : > { %1984 = vmatpush3.bf16.msra.mxu1 %v2278_v27  ;;  %1921 = vmatprep.subr.bf16.mxu0 %v2279_v28  ;;  %v416_v27 = vpack.c.bf16 %v320_v22, %v312_v21  ;;  %v2296_v28 = vld [vmem:[%s2802_s1 + $0x118] sm:$0xff]   ;;  %v2299_v42 = vld [vmem:[%s2802_s1 + $0x160] sm:$0xff]   ;;  %v345_v48 = vld [vmem:[%s2484_s12 + $0x288] sm:$0xff] }
  0x23   : > { %1985 = vmatprep.subr.bf16.mxu1 %v2280_v29  ;;  %v418_v29 = vpack.c.bf16 %v322_v25, %v314_v24  ;;  %v353_v49 = vld [vmem:[%s2484_s12 + $0x2c8] sm:$0xff]  ;;  %v347_v51 = vld [vmem:[%s2484_s12 + $0x298] sm:$0xff]  ;;  %v344_v54 = vld [vmem:[%s2484_s12 + $0x280] sm:$0xff] }
  0x24   : > { %v433_v50 = vpack.c.bf16 %v353_v49, %v345_v48  ;;  %v352_v55 = vld [vmem:[%s2484_s12 + $0x2c0] sm:$0xff]  ;;  %v346_v56 = vld [vmem:[%s2484_s12 + $0x290] sm:$0xff]  ;;  %v2303_v58 = vld [vmem:[%s2802_s1 + $0x168] sm:$0xff]  }
  0x25   : > { %1922 = vmatpush3.bf16.msra.mxu0 %v2281_v30  ;;  %v2297_v30 = vld [vmem:[%s2802_s1 + $0x1d8] sm:$0xff]   ;;  %v369_v0 = vld [vmem:[%s2484_s12 + $0x348] sm:$0xff]  ;;  %v368_v7 = vld [vmem:[%s2484_s12 + $0x340] sm:$0xff] }
  0x26   : > { %1986 = vmatpush3.bf16.msra.mxu1 %v2282_v31  ;;  %2035 = vmatprep.subr.bf16.mxu0 %v2283_v44  ;;  %v2298_v31 = vld [vmem:[%s2802_s1 + $0x198] sm:$0xff]   ;;  %v424_v44 = vpack.c.bf16 %v336_v39, %v328_v38  ;;  %v2307_v8 = vld [vmem:[%s2802_s1 + $0x170] sm:$0xff]   ;;  %v268_v38 = vld [vmem:[%s2484_s12 + $0x20] sm:$0xff] }
  0x27   : > { %2099 = vmatprep.subr.bf16.mxu1 %v2285_v46  ;;  %v363_v1 = vld [vmem:[%s2484_s12 + $0x318] sm:$0xff]  ;;  %v362_v9 = vld [vmem:[%s2484_s12 + $0x310] sm:$0xff]  ;;  %v276_v39 = vld [vmem:[%s2484_s12 + $0x60] sm:$0xff] }
  0x28   : > { %1001 = vmatmul.mubr.bf16.vlgmr.msra.gmra.mrb[0].mxu0 %v392_v40  ;;  %v330_v40 = vld [vmem:[%s2484_s12 + $0x210] sm:$0xff]  ;;  %v371_v4 = vld [vmem:[%s2484_s12 + $0x358] sm:$0xff] }
  0x29   : > { %1098 = vmatmul.mubr.bf16.vlgmr.msra.gmra.mrb[0].mxu1 %v394_v43  ;;  %2036 = vmatpush3.bf16.msra.mxu0 %v2284_v45  ;;  %v2300_v43 = vld [vmem:[%s2802_s1 + $0x120] sm:$0xff]   ;;  %v426_v46 = vpack.c.bf16 %v338_v41, %v330_v40  ;;  %v443_v5 = vpack.c.bf16 %v371_v4, %v363_v1  ;;  %v379_v16 = vld [vmem:[%s2484_s12 + $0x398] sm:$0xff]  ;;  %v270_v40 = vld [vmem:[%s2484_s12 + $0x30] sm:$0xff] }
  0x2a   : > { %2100 = vmatpush3.bf16.msra.mxu1 %v2286_v47  ;;  %1008 = vmatprep.mubr.bf16.mxu0 %v401_v52  ;;  %v2301_v45 = vld [vmem:[%s2802_s1 + $0x1e0] sm:$0xff]   ;;  %v355_v52 = vld [vmem:[%s2484_s12 + $0x2d8] sm:$0xff]  ;;  %v278_v41 = vld [vmem:[%s2484_s12 + $0x70] sm:$0xff] }
  0x2b   : > { %1105 = vmatprep.mubr.bf16.mxu1 %v403_v53  ;;  %2037 = vmatprep.subr.bf16.mxu0 %v2287_v60  ;;  %v2302_v47 = vld [vmem:[%s2802_s1 + $0x1a0] sm:$0xff]   ;;  %v435_v53 = vpack.c.bf16 %v355_v52, %v347_v51  ;;  %v2305_v60 = vld [vmem:[%s2802_s1 + $0x1e8] sm:$0xff]   ;;  %v387_v17 = vld [vmem:[%s2484_s12 + $0x3d8] sm:$0xff] }
  0x2c   : > { %2101 = vmatprep.subr.bf16.mxu1 %v2289_v62  ;;  %v432_v62 = vpack.c.bf16 %v352_v55, %v344_v54  ;;  %v451_v21 = vpack.c.bf16 %v387_v17, %v379_v16  ;;  %v2311_v22 = vld [vmem:[%s2802_s1 + $0x178] sm:$0xff]   ;;  %v292_v51 = vld [vmem:[%s2484_s12 + $0xe0] sm:$0xff]  ;;  %v286_v52 = vld [vmem:[%s2484_s12 + $0xb0] sm:$0xff] }
  0x2d   : > { %2038 = vmatpush3.bf16.msra.mxu0 %v2288_v61  ;;  %v2306_v61 = vld [vmem:[%s2802_s1 + $0x1a8] sm:$0xff]   ;;  %v2312_v24 = vld [vmem:[%s2802_s1 + $0x138] sm:$0xff]   ;;  %v310_v1 = vld [vmem:[%s2484_s12 + $0x170] sm:$0xff] }
  0x2e   : > { %2102 = vmatpush3.bf16.msra.mxu1 %v2290_v63  ;;  %2039 = vmatprep.subr.bf16.mxu0 %v2291_v11  ;;  %v361_v63 = vld [vmem:[%s2484_s12 + $0x308] sm:$0xff]  ;;  %v2308_v11 = vld [vmem:[%s2802_s1 + $0x130] sm:$0xff]   ;;  %v2313_v25 = vld [vmem:[%s2802_s1 + $0x1f8] sm:$0xff]  }
  0x2f   : > { %2103 = vmatprep.subr.bf16.mxu1 %v2293_v14  ;;  %v441_v3 = vpack.c.bf16 %v369_v0, %v361_v63  ;;  %v377_v14 = vld [vmem:[%s2484_s12 + $0x388] sm:$0xff]  ;;  %v271_v32 = vld [vmem:[%s2484_s12 + $0x38] sm:$0xff]  ;;  %v308_v63 = vld [vmem:[%s2484_s12 + $0x160] sm:$0xff] }
  0x30   : > { %1009 = vmatmul.mubr.bf16.gmra.mrb[4].mxu0 %v400_v57  ;;  %v354_v57 = vld [vmem:[%s2484_s12 + $0x2d0] sm:$0xff]  ;;  %v279_v33 = vld [vmem:[%s2484_s12 + $0x78] sm:$0xff]  ;;  %v301_v54 = vld [vmem:[%s2484_s12 + $0x128] sm:$0xff] }
  0x31   : > { %1106 = vmatmul.mubr.bf16.gmra.mrb[4].mxu1 %v402_v59  ;;  %1016 = vmatprep.mubr.bf16.mxu0 %v409_v2  ;;  %v2304_v59 = vld [vmem:[%s2802_s1 + $0x128] sm:$0xff]   ;;  %v434_v2 = vpack.c.bf16 %v354_v57, %v346_v56  ;;  %v303_v56 = vld [vmem:[%s2484_s12 + $0x138] sm:$0xff]  ;;  %v302_v0 = vld [vmem:[%s2484_s12 + $0x130] sm:$0xff] }
  0x32   : > { %1113 = vmatprep.mubr.bf16.mxu1 %v411_v6  ;;  %2040 = vmatpush3.bf16.msra.mxu0 %v2292_v13  ;;  %v360_v6 = vld [vmem:[%s2484_s12 + $0x300] sm:$0xff]  ;;  %v2310_v13 = vld [vmem:[%s2802_s1 + $0x1b0] sm:$0xff]   ;;  %v309_v55 = vld [vmem:[%s2484_s12 + $0x168] sm:$0xff] }
  0x33   : > { %2104 = vmatpush3.bf16.msra.mxu1 %v2294_v15  ;;  %2041 = vmatprep.subr.bf16.mxu0 %v2295_v26  ;;  %v385_v15 = vld [vmem:[%s2484_s12 + $0x3c8] sm:$0xff]  ;;  %v440_v18 = vpack.c.bf16 %v368_v7, %v360_v6  ;;  %v384_v26 = vld [vmem:[%s2484_s12 + $0x3c0] sm:$0xff]  ;;  %v311_v57 = vld [vmem:[%s2484_s12 + $0x178] sm:$0xff]  ;;  %v414_v7 = vpack.c.bf16 %v310_v1, %v302_v0 }
  0x34   : > { %2105 = vmatprep.subr.bf16.mxu1 %v2297_v30  ;;  %v449_v20 = vpack.c.bf16 %v385_v15, %v377_v14  ;;  %v269_v30 = vld [vmem:[%s2484_s12 + $0x28] sm:$0xff]  ;;  %v319_v4 = vld [vmem:[%s2484_s12 + $0x1b8] sm:$0xff]  ;;  %v2315_v0 = vld [vmem:[%s2803_s2] sm:$0xff]  }
  0x35   : > { %v333_v14 = vld [vmem:[%s2484_s12 + $0x228] sm:$0xff]  ;;  %v335_v16 = vld [vmem:[%s2484_s12 + $0x238] sm:$0xff] }
  0x36   : > { %2042 = vmatpush3.bf16.msra.mxu0 %v2296_v28  ;;  %v2314_v28 = vld [vmem:[%s2802_s1 + $0x1b8] sm:$0xff]   ;;  %v341_v15 = vld [vmem:[%s2484_s12 + $0x268] sm:$0xff] }
  0x37   : > { %2106 = vmatpush3.bf16.msra.mxu1 %v2298_v31  ;;  %2043 = vmatprep.subr.bf16.mxu0 %v2299_v42  ;;  %v277_v31 = vld [vmem:[%s2484_s12 + $0x68] sm:$0xff]  ;;  %v343_v17 = vld [vmem:[%s2484_s12 + $0x278] sm:$0xff] }
  0x38   : > { %1017 = vmatmul.mubr.bf16.gmra.mrb[8].mxu0 %v408_v10  ;;  %2107 = vmatprep.subr.bf16.mxu1 %v2301_v45  ;;  %v370_v10 = vld [vmem:[%s2484_s12 + $0x350] sm:$0xff]  ;;  %v285_v42 = vld [vmem:[%s2484_s12 + $0xa8] sm:$0xff]  ;;  %v295_v45 = vld [vmem:[%s2484_s12 + $0xf8] sm:$0xff] }
  0x39   : > { %1114 = vmatmul.mubr.bf16.gmra.mrb[8].mxu1 %v410_v12  ;;  %1024 = vmatprep.mubr.bf16.mxu0 %v417_v19  ;;  %v2309_v12 = vld [vmem:[%s2802_s1 + $0x1f0] sm:$0xff]   ;;  %v442_v19 = vpack.c.bf16 %v370_v10, %v362_v9  ;;  %v316_v10 = vld [vmem:[%s2484_s12 + $0x1a0] sm:$0xff]  ;;  %v2316_v1 = vld [vmem:[%s2803_s2 + $0x8] sm:$0xff]  }
  0x3a   : > { %1121 = vmatprep.mubr.bf16.mxu1 %v419_v23  ;;  %2044 = vmatpush3.bf16.msra.mxu0 %v2300_v43  ;;  %v376_v23 = vld [vmem:[%s2484_s12 + $0x380] sm:$0xff]  ;;  %v293_v43 = vld [vmem:[%s2484_s12 + $0xe8] sm:$0xff] }
  0x3b   : > { %2108 = vmatpush3.bf16.msra.mxu1 %v2302_v47  ;;  %2045 = vmatprep.subr.bf16.mxu0 %v2303_v58  ;;  %v448_v34 = vpack.c.bf16 %v384_v26, %v376_v23  ;;  %v398_v47 = vpack.c.bf16 %v278_v41, %v270_v40  ;;  %v405_v48 = vpack.c.bf16 %v293_v43, %v285_v42  ;;  %v340_v23 = vld [vmem:[%s2484_s12 + $0x260] sm:$0xff]  ;;  %v349_v26 = vld [vmem:[%s2484_s12 + $0x2a8] sm:$0xff]  ;;  %v367_v40 = vld [vmem:[%s2484_s12 + $0x338] sm:$0xff] }
  0x3c   : > { %2109 = vmatprep.subr.bf16.mxu1 %v2305_v60  ;;  %v413_v60 = vpack.c.bf16 %v309_v55, %v301_v54  ;;  %v375_v41 = vld [vmem:[%s2484_s12 + $0x378] sm:$0xff] }
  0x3e   : > { %2046 = vmatpush3.bf16.msra.mxu0 %v2304_v59 }
  0x3f   : > { %2110 = vmatpush3.bf16.msra.mxu1 %v2306_v61  ;;  %2047 = vmatprep.subr.bf16.mxu0 %v2307_v8  ;;  %v415_v61 = vpack.c.bf16 %v311_v57, %v303_v56 }
  0x40   : > { %1025 = vmatmul.mubr.bf16.gmra.mrb[12].mxu0 %v416_v27  ;;  %2111 = vmatprep.subr.bf16.mxu1 %v2309_v12  ;;  %v378_v27 = vld [vmem:[%s2484_s12 + $0x390] sm:$0xff] }
  0x41   : > { %1122 = vmatmul.mubr.bf16.gmra.mrb[12].mxu1 %v418_v29  ;;  %1032 = vmatprep.mubr.bf16.mxu0 %v425_v36  ;;  %v386_v29 = vld [vmem:[%s2484_s12 + $0x3d0] sm:$0xff]  ;;  %v397_v36 = vpack.c.bf16 %v277_v31, %v269_v30 }
  0x42   : > { %1129 = vmatprep.mubr.bf16.mxu1 %v427_v37  ;;  %2048 = vmatpush3.bf16.msra.mxu0 %v2308_v11  ;;  %v450_v35 = vpack.c.bf16 %v386_v29, %v378_v27  ;;  %v399_v37 = vpack.c.bf16 %v279_v33, %v271_v32  ;;  %v324_v11 = vld [vmem:[%s2484_s12 + $0x1e0] sm:$0xff]  ;;  %v318_v12 = vld [vmem:[%s2484_s12 + $0x1b0] sm:$0xff]  ;;  %v357_v27 = vld [vmem:[%s2484_s12 + $0x2e8] sm:$0xff] }
  0x43   : > { %2112 = vmatpush3.bf16.msra.mxu1 %v2310_v13  ;;  %2049 = vmatprep.subr.bf16.mxu0 %v2311_v22  ;;  %v326_v13 = vld [vmem:[%s2484_s12 + $0x1f0] sm:$0xff]  ;;  %v332_v22 = vld [vmem:[%s2484_s12 + $0x220] sm:$0xff]  ;;  %v359_v29 = vld [vmem:[%s2484_s12 + $0x2f8] sm:$0xff]  ;;  %v437_v32 = vpack.c.bf16 %v357_v27, %v349_v26 }
  0x44   : > { %2113 = vmatprep.subr.bf16.mxu1 %v2313_v25  ;;  %v342_v25 = vld [vmem:[%s2484_s12 + $0x270] sm:$0xff]  ;;  %v428_v30 = vpack.c.bf16 %v340_v23, %v332_v22 }
  0x46   : > { %2050 = vmatpush3.bf16.msra.mxu0 %v2312_v24  ;;  %v334_v24 = vld [vmem:[%s2484_s12 + $0x230] sm:$0xff] }
  0x47   : > { %2114 = vmatpush3.bf16.msra.mxu1 %v2314_v28  ;;  %v351_v28 = vld [vmem:[%s2484_s12 + $0x2b8] sm:$0xff]  ;;  %v430_v31 = vpack.c.bf16 %v342_v25, %v334_v24  ;;  %2179 = vmatprep.subr.bf16.mxu0 %v2315_v0 }
  0x48   : > { %1033 = vmatmul.mubr.bf16.gmra.mrb[16].mxu0 %v424_v44  ;;  %v287_v44 = vld [vmem:[%s2484_s12 + $0xb8] sm:$0xff]  ;;  %v439_v33 = vpack.c.bf16 %v359_v29, %v351_v28  ;;  %2211 = vmatprep.subr.bf16.mxu1 %v2315_v0 }
  0x49   : > { %1130 = vmatmul.mubr.bf16.gmra.mrb[16].mxu1 %v426_v46  ;;  %1040 = vmatprep.mubr.bf16.mxu0 %v433_v50  ;;  %v396_v46 = vpack.c.bf16 %v276_v39, %v268_v38  ;;  %v407_v49 = vpack.c.bf16 %v295_v45, %v287_v44  ;;  %v284_v50 = vld [vmem:[%s2484_s12 + $0xa0] sm:$0xff]  ;;  %v365_v38 = vld [vmem:[%s2484_s12 + $0x328] sm:$0xff]  ;;  %v447_v45 = vpack.c.bf16 %v375_v41, %v367_v40 }
  0x4a   : > { %1137 = vmatprep.mubr.bf16.mxu1 %v435_v53  ;;  %v294_v53 = vld [vmem:[%s2484_s12 + $0xf0] sm:$0xff]  ;;  %v404_v58 = vpack.c.bf16 %v292_v51, %v284_v50  ;;  %v373_v39 = vld [vmem:[%s2484_s12 + $0x368] sm:$0xff] }
  0x4b   : > { %v406_v59 = vpack.c.bf16 %v294_v53, %v286_v52  ;;  %v445_v44 = vpack.c.bf16 %v373_v39, %v365_v38  ;;  %v381_v50 = vld [vmem:[%s2484_s12 + $0x3a8] sm:$0xff]  ;;  %v383_v52 = vld [vmem:[%s2484_s12 + $0x3b8] sm:$0xff] }
  0x4c   : > { %v389_v51 = vld [vmem:[%s2484_s12 + $0x3e8] sm:$0xff]  ;;  %v391_v53 = vld [vmem:[%s2484_s12 + $0x3f8] sm:$0xff] }
  0x4d   : > { %v453_v56 = vpack.c.bf16 %v389_v51, %v381_v50  ;;  %v455_v57 = vpack.c.bf16 %v391_v53, %v383_v52 }
  0x50   : > { %1041 = vmatmul.mubr.bf16.gmra.mrb[20].mxu0 %v432_v62  ;;  %v300_v62 = vld [vmem:[%s2484_s12 + $0x120] sm:$0xff] }
  0x51   : > { %1138 = vmatmul.mubr.bf16.gmra.mrb[20].mxu1 %v434_v2  ;;  %1048 = vmatprep.mubr.bf16.mxu0 %v441_v3  ;;  %v317_v2 = vld [vmem:[%s2484_s12 + $0x1a8] sm:$0xff]  ;;  %v412_v6 = vpack.c.bf16 %v308_v63, %v300_v62 }
  0x52   : > { %1145 = vmatprep.mubr.bf16.mxu1 %v443_v5  ;;  %v325_v3 = vld [vmem:[%s2484_s12 + $0x1e8] sm:$0xff]  ;;  %v327_v5 = vld [vmem:[%s2484_s12 + $0x1f8] sm:$0xff] }
  0x53   : > { %v421_v8 = vpack.c.bf16 %v325_v3, %v317_v2  ;;  %v423_v9 = vpack.c.bf16 %v327_v5, %v319_v4  ;;  %v2317_v2 = vld [vmem:[%s2803_s2 + $0x10] sm:$0xff]   ;;  %v2318_v3 = vld [vmem:[%s2803_s2 + $0x18] sm:$0xff]   ;;  %v2319_v4 = vld [vmem:[%s2803_s2 + $0x20] sm:$0xff]  }
  0x54   : > { %v2320_v5 = vld [vmem:[%s2803_s2 + $0x28] sm:$0xff]  }
  0x58   : > { %1049 = vmatmul.mubr.bf16.gmra.mrb[24].mxu0 %v440_v18  ;;  %v420_v18 = vpack.c.bf16 %v324_v11, %v316_v10 }
  0x59   : > { %1146 = vmatmul.mubr.bf16.gmra.mrb[24].mxu1 %v442_v19  ;;  %1056 = vmatprep.mubr.bf16.mxu0 %v449_v20  ;;  %v422_v19 = vpack.c.bf16 %v326_v13, %v318_v12  ;;  %v429_v20 = vpack.c.bf16 %v341_v15, %v333_v14 }
  0x5a   : > { %1153 = vmatprep.mubr.bf16.mxu1 %v451_v21  ;;  %v431_v21 = vpack.c.bf16 %v343_v17, %v335_v16 }
  0x60   : > { %1057 = vmatmul.mubr.bf16.gmra.mrb[28].mxu0 %v448_v34  ;;  %v348_v34 = vld [vmem:[%s2484_s12 + $0x2a0] sm:$0xff] }
  0x61   : > { %1154 = vmatmul.mubr.bf16.gmra.mrb[28].mxu1 %v450_v35  ;;  %1194 = vmatprep.mubr.bf16.mxu0 %v397_v36  ;;  %v356_v35 = vld [vmem:[%s2484_s12 + $0x2e0] sm:$0xff]  ;;  %v350_v36 = vld [vmem:[%s2484_s12 + $0x2b0] sm:$0xff] }
  0x62   : > { %1291 = vmatprep.mubr.bf16.mxu1 %v399_v37  ;;  %v358_v37 = vld [vmem:[%s2484_s12 + $0x2f0] sm:$0xff]  ;;  %v436_v42 = vpack.c.bf16 %v356_v35, %v348_v34 }
  0x63   : > { %v438_v43 = vpack.c.bf16 %v358_v37, %v350_v36 }
  0x68   : > { %1195 = vmatmul.mubr.bf16.vlgmr.msra.gmra.mrb[32].mxu0 %v396_v46  ;;  %v364_v46 = vld [vmem:[%s2484_s12 + $0x320] sm:$0xff] }
  0x69   : > { %1292 = vmatmul.mubr.bf16.vlgmr.msra.gmra.mrb[32].mxu1 %v398_v47  ;;  %1202 = vmatprep.mubr.bf16.mxu0 %v405_v48  ;;  %v372_v47 = vld [vmem:[%s2484_s12 + $0x360] sm:$0xff]  ;;  %v366_v48 = vld [vmem:[%s2484_s12 + $0x330] sm:$0xff] }
  0x6a   : > { %1299 = vmatprep.mubr.bf16.mxu1 %v407_v49  ;;  %v374_v49 = vld [vmem:[%s2484_s12 + $0x370] sm:$0xff]  ;;  %v444_v54 = vpack.c.bf16 %v372_v47, %v364_v46  ;;  %2180 = vmatpush3.bf16.msra.mxu0 %v2315_v0 }
  0x6b   : > { %v446_v55 = vpack.c.bf16 %v374_v49, %v366_v48  ;;  %2219 = vmatpush3.bf16.msra.mxu1 %v2315_v0  ;;  %2181 = vmatprep.subr.bf16.mxu0 %v2316_v1 }
  0x6c   : > { %2212 = vmatprep.subr.bf16.mxu1 %v2316_v1 }
  0x6e   : > { %2182 = vmatpush3.bf16.msra.mxu0 %v2316_v1 }
  0x6f   : > { %2220 = vmatpush3.bf16.msra.mxu1 %v2316_v1  ;;  %2183 = vmatprep.subr.bf16.mxu0 %v2317_v2 }
  0x70   : > { %1203 = vmatmul.mubr.bf16.gmra.mrb[36].mxu0 %v404_v58  ;;  %v380_v58 = vld [vmem:[%s2484_s12 + $0x3a0] sm:$0xff]  ;;  %2213 = vmatprep.subr.bf16.mxu1 %v2317_v2 }
  0x71   : > { %1300 = vmatmul.mubr.bf16.gmra.mrb[36].mxu1 %v406_v59  ;;  %1210 = vmatprep.mubr.bf16.mxu0 %v413_v60  ;;  %v388_v59 = vld [vmem:[%s2484_s12 + $0x3e0] sm:$0xff]  ;;  %v382_v60 = vld [vmem:[%s2484_s12 + $0x3b0] sm:$0xff] }
  0x72   : > { %1307 = vmatprep.mubr.bf16.mxu1 %v415_v61  ;;  %v390_v61 = vld [vmem:[%s2484_s12 + $0x3f0] sm:$0xff]  ;;  %v452_v62 = vpack.c.bf16 %v388_v59, %v380_v58  ;;  %2184 = vmatpush3.bf16.msra.mxu0 %v2317_v2 }
  0x73   : > { %v454_v63 = vpack.c.bf16 %v390_v61, %v382_v60  ;;  %2221 = vmatpush3.bf16.msra.mxu1 %v2317_v2  ;;  %2185 = vmatprep.subr.bf16.mxu0 %v2318_v3 }
  0x74   : > { %2214 = vmatprep.subr.bf16.mxu1 %v2318_v3 }
  0x76   : > { %2186 = vmatpush3.bf16.msra.mxu0 %v2318_v3 }
  0x77   : > { %2222 = vmatpush3.bf16.msra.mxu1 %v2318_v3  ;;  %2187 = vmatprep.subr.bf16.mxu0 %v2319_v4 }
  0x78   : > { %1211 = vmatmul.mubr.bf16.gmra.mrb[40].mxu0 %v412_v6  ;;  %2215 = vmatprep.subr.bf16.mxu1 %v2319_v4  ;;  %v2321_v6 = vld [vmem:[%s2803_s2 + $0x30] sm:$0xff]  }
  0x79   : > { %1308 = vmatmul.mubr.bf16.gmra.mrb[40].mxu1 %v414_v7  ;;  %1218 = vmatprep.mubr.bf16.mxu0 %v421_v8  ;;  %v2322_v7 = vld [vmem:[%s2803_s2 + $0x38] sm:$0xff]  }
  0x7a   : > { %1315 = vmatprep.mubr.bf16.mxu1 %v423_v9  ;;  %2188 = vmatpush3.bf16.msra.mxu0 %v2319_v4 }
  0x7b   : > { %2223 = vmatpush3.bf16.msra.mxu1 %v2319_v4  ;;  %2189 = vmatprep.subr.bf16.mxu0 %v2320_v5 }
  0x7c   : > { %2216 = vmatprep.subr.bf16.mxu1 %v2320_v5 }
  0x7e   : > { %2190 = vmatpush3.bf16.msra.mxu0 %v2320_v5 }
  0x7f   : > { %2224 = vmatpush3.bf16.msra.mxu1 %v2320_v5  ;;  %2191 = vmatprep.subr.bf16.mxu0 %v2321_v6 }
  0x80   : > { %1219 = vmatmul.mubr.bf16.gmra.mrb[44].mxu0 %v420_v18  ;;  %2217 = vmatprep.subr.bf16.mxu1 %v2321_v6 }
  0x81   : > { %1316 = vmatmul.mubr.bf16.gmra.mrb[44].mxu1 %v422_v19  ;;  %1226 = vmatprep.mubr.bf16.mxu0 %v429_v20 }
  0x82   : > { %1323 = vmatprep.mubr.bf16.mxu1 %v431_v21  ;;  %2192 = vmatpush3.bf16.msra.mxu0 %v2321_v6 }
  0x83   : > { %2225 = vmatpush3.bf16.msra.mxu1 %v2321_v6  ;;  %2193 = vmatprep.subr.bf16.mxu0 %v2322_v7 }
  0x84   : > { %2218 = vmatprep.subr.bf16.mxu1 %v2322_v7 }
  0x86   : > { %2194 = vmatpush3.bf16.msra.mxu0 %v2322_v7 }
  0x87   : > { %2226 = vmatpush3.bf16.msra.mxu1 %v2322_v7 }
  0x88   : > { %1227 = vmatmul.mubr.bf16.gmra.mrb[48].mxu0 %v428_v30 }
  0x89   : > { %1324 = vmatmul.mubr.bf16.gmra.mrb[48].mxu1 %v430_v31  ;;  %1234 = vmatprep.mubr.bf16.mxu0 %v437_v32 }
  0x8a   : > { %1331 = vmatprep.mubr.bf16.mxu1 %v439_v33 }
  0x90   : > { %1235 = vmatmul.mubr.bf16.gmra.mrb[52].mxu0 %v436_v42 }
  0x91   : > { %1332 = vmatmul.mubr.bf16.gmra.mrb[52].mxu1 %v438_v43  ;;  %1242 = vmatprep.mubr.bf16.mxu0 %v445_v44 }
  0x92   : > { %1339 = vmatprep.mubr.bf16.mxu1 %v447_v45 }
  0x98   : > { %1243 = vmatmul.mubr.bf16.gmra.mrb[56].mxu0 %v444_v54 }
  0x99   : > { %1340 = vmatmul.mubr.bf16.gmra.mrb[56].mxu1 %v446_v55  ;;  %1250 = vmatprep.mubr.bf16.mxu0 %v453_v56 }
  0x9a   : > { %1347 = vmatprep.mubr.bf16.mxu1 %v455_v57 }
  0xa0   : > { %1251 = vmatmul.mubr.bf16.gmra.mrb[60].mxu0 %v452_v62 }
  0xa1   : > { %1348 = vmatmul.mubr.bf16.gmra.mrb[60].mxu1 %v454_v63 }
  0xfb   : > { %v1923_v8 = vpop.f32.mrb[0].mxu0 }
  0xfc   : > { %v1987_v9 = vpop.f32.mrb[0].mxu1  ;;  %v1924_v10 = vpop.f32.mrb[1].mxu0 }
  0xfd   : > { %v1925_v11 = vadd.f32 %v1924_v10, %v1923_v8  ;;  %v1988_v12 = vpop.f32.mrb[1].mxu1  ;;  %v1926_v13 = vpop.f32.mrb[2].mxu0 }
  0xfe   : > { %v1989_v14 = vadd.f32 %v1988_v12, %v1987_v9  ;;  %v1990_v15 = vpop.f32.mrb[2].mxu1  ;;  %v1927_v16 = vpop.f32.mrb[3].mxu0 }
  0xff   : > { %v1928_v17 = vadd.f32 %v1927_v16, %v1926_v13  ;;  %v1991_v18 = vpop.f32.mrb[3].mxu1 }
 0x100   : > { %v2740_v19 = vadd.f32 %v1989_v14, %v1925_v11  ;;  %v1992_v20 = vadd.f32 %v1991_v18, %v1990_v15 }
 0x102   : > { %v2742_v21 = vadd.f32 %v1992_v20, %v1928_v17 }
 0x103   : > { %v1929_v22 = vpop.f32.mrb[4].mxu0 }
 0x104   : > { %v1993_v23 = vpop.f32.mrb[4].mxu1  ;;  %v1930_v24 = vpop.f32.mrb[5].mxu0 }
 0x105   : > { %v1931_v25 = vadd.f32 %v1930_v24, %v1929_v22  ;;  %v1994_v26 = vpop.f32.mrb[5].mxu1  ;;  %v1932_v27 = vpop.f32.mrb[6].mxu0 }
 0x106   : > { %v1995_v28 = vadd.f32 %v1994_v26, %v1993_v23  ;;  %v1996_v29 = vpop.f32.mrb[6].mxu1  ;;  %v1933_v30 = vpop.f32.mrb[7].mxu0 }
 0x107   : > { %v1934_v31 = vadd.f32 %v1933_v30, %v1932_v27  ;;  %v1997_v32 = vpop.f32.mrb[7].mxu1 }
 0x108   : > { %v2744_v33 = vadd.f32 %v1995_v28, %v1931_v25  ;;  %v1998_v34 = vadd.f32 %v1997_v32, %v1996_v29 }
 0x10a   : > { %v2746_v35 = vadd.f32 %v1998_v34, %v1934_v31 }
 0x10b   : > { %v1935_v36 = vpop.f32.mrb[8].mxu0 }
 0x10c   : > { %v1999_v37 = vpop.f32.mrb[8].mxu1  ;;  %v1936_v38 = vpop.f32.mrb[9].mxu0 }
 0x10d   : > { %v1937_v39 = vadd.f32 %v1936_v38, %v1935_v36  ;;  %v2000_v40 = vpop.f32.mrb[9].mxu1  ;;  %v1938_v41 = vpop.f32.mrb[10].mxu0 }
 0x10e   : > { %v2001_v42 = vadd.f32 %v2000_v40, %v1999_v37  ;;  %v2002_v43 = vpop.f32.mrb[10].mxu1  ;;  %v1939_v44 = vpop.f32.mrb[11].mxu0 }
 0x10f   : > { %v1940_v45 = vadd.f32 %v1939_v44, %v1938_v41  ;;  %v2003_v46 = vpop.f32.mrb[11].mxu1 }
 0x110   : > { %v2748_v47 = vadd.f32 %v2001_v42, %v1937_v39  ;;  %v2004_v48 = vadd.f32 %v2003_v46, %v2002_v43 }
 0x112   : > { %v2750_v49 = vadd.f32 %v2004_v48, %v1940_v45 }
 0x113   : > { %v1941_v50 = vpop.f32.mrb[12].mxu0 }
 0x114   : > { %v2005_v51 = vpop.f32.mrb[12].mxu1  ;;  %v1942_v52 = vpop.f32.mrb[13].mxu0 }
 0x115   : > { %v1943_v53 = vadd.f32 %v1942_v52, %v1941_v50  ;;  %v2006_v54 = vpop.f32.mrb[13].mxu1  ;;  %v1944_v55 = vpop.f32.mrb[14].mxu0 }
 0x116   : > { %v2007_v56 = vadd.f32 %v2006_v54, %v2005_v51  ;;  %v2008_v57 = vpop.f32.mrb[14].mxu1  ;;  %v1945_v58 = vpop.f32.mrb[15].mxu0 }
 0x117   : > { %v1946_v59 = vadd.f32 %v1945_v58, %v1944_v55  ;;  %v2009_v60 = vpop.f32.mrb[15].mxu1 }
 0x118   : > { %v2752_v61 = vadd.f32 %v2007_v56, %v1943_v53  ;;  %v2010_v62 = vadd.f32 %v2009_v60, %v2008_v57 }
 0x11a   : > { %v2754_v63 = vadd.f32 %v2010_v62, %v1946_v59 }
 0x11b   : > { %v1947_v0 = vpop.f32.mrb[16].mxu0 }
 0x11c   : > { %v2011_v1 = vpop.f32.mrb[16].mxu1  ;;  %v1948_v2 = vpop.f32.mrb[17].mxu0 }
 0x11d   : > { %v1949_v3 = vadd.f32 %v1948_v2, %v1947_v0  ;;  %v2012_v4 = vpop.f32.mrb[17].mxu1  ;;  %v1950_v5 = vpop.f32.mrb[18].mxu0 }
 0x11e   : > { %v2013_v6 = vadd.f32 %v2012_v4, %v2011_v1  ;;  %v2014_v7 = vpop.f32.mrb[18].mxu1  ;;  %v1951_v8 = vpop.f32.mrb[19].mxu0 }
 0x11f   : > { %v1952_v9 = vadd.f32 %v1951_v8, %v1950_v5  ;;  %v2015_v10 = vpop.f32.mrb[19].mxu1 }
 0x120   : > { %v2756_v11 = vadd.f32 %v2013_v6, %v1949_v3  ;;  %v2016_v12 = vadd.f32 %v2015_v10, %v2014_v7 }
 0x122   : > { %v2758_v13 = vadd.f32 %v2016_v12, %v1952_v9 }
 0x123   : > { %v1953_v14 = vpop.f32.mrb[20].mxu0 }
 0x124   : > { %v2017_v15 = vpop.f32.mrb[20].mxu1  ;;  %v1954_v16 = vpop.f32.mrb[21].mxu0 }
 0x125   : > { %v1955_v17 = vadd.f32 %v1954_v16, %v1953_v14  ;;  %v2018_v18 = vpop.f32.mrb[21].mxu1  ;;  %v1956_v20 = vpop.f32.mrb[22].mxu0 }
 0x126   : > { %v2019_v22 = vadd.f32 %v2018_v18, %v2017_v15  ;;  %v2020_v23 = vpop.f32.mrb[22].mxu1  ;;  %v1957_v24 = vpop.f32.mrb[23].mxu0 }
 0x127   : > { %v1958_v25 = vadd.f32 %v1957_v24, %v1956_v20  ;;  %v2021_v26 = vpop.f32.mrb[23].mxu1 }
 0x128   : > { %v2760_v27 = vadd.f32 %v2019_v22, %v1955_v17  ;;  %v2022_v28 = vadd.f32 %v2021_v26, %v2020_v23 }
 0x12a   : > { %v2762_v29 = vadd.f32 %v2022_v28, %v1958_v25 }
 0x12b   : > { %v1959_v30 = vpop.f32.mrb[24].mxu0 }
 0x12c   : > { %v2023_v31 = vpop.f32.mrb[24].mxu1  ;;  %v1960_v32 = vpop.f32.mrb[25].mxu0 }
 0x12d   : > { %v1961_v34 = vadd.f32 %v1960_v32, %v1959_v30  ;;  %v2024_v36 = vpop.f32.mrb[25].mxu1  ;;  %v1962_v37 = vpop.f32.mrb[26].mxu0 }
 0x12e   : > { %v2025_v38 = vadd.f32 %v2024_v36, %v2023_v31  ;;  %v2026_v39 = vpop.f32.mrb[26].mxu1  ;;  %v1963_v40 = vpop.f32.mrb[27].mxu0 }
 0x12f   : > { %v1964_v41 = vadd.f32 %v1963_v40, %v1962_v37  ;;  %v2027_v42 = vpop.f32.mrb[27].mxu1 }
 0x130   : > { %v2764_v43 = vadd.f32 %v2025_v38, %v1961_v34  ;;  %v2028_v44 = vadd.f32 %v2027_v42, %v2026_v39 }
 0x132   : > { %v2766_v45 = vadd.f32 %v2028_v44, %v1964_v41 }
 0x133   : > { %v1965_v46 = vpop.f32.mrb[28].mxu0 }
 0x134   : > { %v2029_v48 = vpop.f32.mrb[28].mxu1  ;;  %v1966_v50 = vpop.f32.mrb[29].mxu0 }
 0x135   : > { %v1967_v51 = vadd.f32 %v1966_v50, %v1965_v46  ;;  %v2030_v52 = vpop.f32.mrb[29].mxu1  ;;  %v1968_v53 = vpop.f32.mrb[30].mxu0 }
 0x136   : > { %v2031_v54 = vadd.f32 %v2030_v52, %v2029_v48  ;;  %v2032_v55 = vpop.f32.mrb[30].mxu1  ;;  %v1969_v56 = vpop.f32.mrb[31].mxu0 }
 0x137   : > { %v1970_v57 = vadd.f32 %v1969_v56, %v1968_v53  ;;  %v2033_v58 = vpop.f32.mrb[31].mxu1 }
 0x138   : > { %v2768_v59 = vadd.f32 %v2031_v54, %v1967_v51  ;;  %v2034_v60 = vadd.f32 %v2033_v58, %v2032_v55 }
 0x13a   : > { %v2770_v62 = vadd.f32 %v2034_v60, %v1970_v57 }
 0x13b   : > { %v2051_v0 = vpop.f32.mrb[32].mxu0 }
 0x13c   : > { %v2115_v1 = vpop.f32.mrb[32].mxu1  ;;  %v2052_v2 = vpop.f32.mrb[33].mxu0 }
 0x13d   : > { %v2053_v3 = vadd.f32 %v2052_v2, %v2051_v0  ;;  %v2116_v4 = vpop.f32.mrb[33].mxu1  ;;  %v2054_v5 = vpop.f32.mrb[34].mxu0 }
 0x13e   : > { %v2117_v6 = vadd.f32 %v2116_v4, %v2115_v1  ;;  %v2118_v7 = vpop.f32.mrb[34].mxu1  ;;  %v2055_v8 = vpop.f32.mrb[35].mxu0 }
 0x13f   : > { %v1197_v9 = vadd.f32 %v2053_v3, %v2740_v19  ;;  %v2056_v10 = vadd.f32 %v2055_v8, %v2054_v5  ;;  %v2119_v12 = vpop.f32.mrb[35].mxu1 }
 0x140   : > { %v2120_v14 = vadd.f32 %v2119_v12, %v2118_v7 }
 0x141   : > { %v1294_v15 = vadd.f32 %v2117_v6, %v1197_v9  ;;  %v1200_v16 = vadd.f32 %v2056_v10, %v2742_v21 }
 0x143   : > { %v1297_v17 = vadd.f32 %v2120_v14, %v1200_v16  ;;  %v2057_v18 = vpop.f32.mrb[36].mxu0 }
 0x144   : > { %v2121_v20 = vpop.f32.mrb[36].mxu1  ;;  %v2058_v22 = vpop.f32.mrb[37].mxu0 }
 0x145   : > { %v2059_v23 = vadd.f32 %v2058_v22, %v2057_v18  ;;  %v2122_v24 = vpop.f32.mrb[37].mxu1  ;;  %v2060_v25 = vpop.f32.mrb[38].mxu0  ;;  %v1407_v26 = vpack.c.bf16 %v1297_v17, %v1294_v15 }
 0x146   : > { %v2123_v28 = vadd.f32 %v2122_v24, %v2121_v20  ;;  %v2124_v30 = vpop.f32.mrb[38].mxu1  ;;  %v2061_v31 = vpop.f32.mrb[39].mxu0 }
 0x147   : > { %v1205_v32 = vadd.f32 %v2059_v23, %v2744_v33  ;;  %v2062_v19 = vadd.f32 %v2061_v31, %v2060_v25  ;;  %v2125_v34 = vpop.f32.mrb[39].mxu1  ;;  %2195 = vmatprep.mubr.bf16.mxu0 %v1407_v26 }
 0x148   : > { %v2126_v36 = vadd.f32 %v2125_v34, %v2124_v30 }
 0x149   : > { %v1302_v37 = vadd.f32 %v2123_v28, %v1205_v32  ;;  %v1208_v21 = vadd.f32 %v2062_v19, %v2746_v35 }
 0x14b   : > { %v1305_v38 = vadd.f32 %v2126_v36, %v1208_v21  ;;  %v2063_v39 = vpop.f32.mrb[40].mxu0 }
 0x14c   : > { %v2127_v40 = vpop.f32.mrb[40].mxu1  ;;  %v2064_v41 = vpop.f32.mrb[41].mxu0 }
 0x14d   : > { %v1408_v42 = vpack.c.bf16 %v1305_v38, %v1302_v37  ;;  %v2065_v44 = vadd.f32 %v2064_v41, %v2063_v39  ;;  %v2128_v46 = vpop.f32.mrb[41].mxu1  ;;  %v2066_v48 = vpop.f32.mrb[42].mxu0 }
 0x14e   : > { %v2129_v50 = vadd.f32 %v2128_v46, %v2127_v40  ;;  %v2130_v51 = vpop.f32.mrb[42].mxu1  ;;  %v2067_v52 = vpop.f32.mrb[43].mxu0 }
 0x14f   : > { %v1213_v33 = vadd.f32 %v2065_v44, %v2748_v47  ;;  %v2068_v53 = vadd.f32 %v2067_v52, %v2066_v48  ;;  %v2131_v54 = vpop.f32.mrb[43].mxu1  ;;  %2196 = vmatmul.mubr.bf16.vlgmr.msra.gmra.mrb[64].mxu0 %v1408_v42 }
 0x150   : > { %v2132_v55 = vadd.f32 %v2131_v54, %v2130_v51 }
 0x151   : > { %v1310_v56 = vadd.f32 %v2129_v50, %v1213_v33  ;;  %v1216_v35 = vadd.f32 %v2068_v53, %v2750_v49 }
 0x153   : > { %v1313_v57 = vadd.f32 %v2132_v55, %v1216_v35  ;;  %v2069_v58 = vpop.f32.mrb[44].mxu0 }
 0x154   : > { %v2133_v60 = vpop.f32.mrb[44].mxu1  ;;  %v2070_v0 = vpop.f32.mrb[45].mxu0 }
 0x155   : > { %v2071_v1 = vadd.f32 %v2070_v0, %v2069_v58  ;;  %v2134_v2 = vpop.f32.mrb[45].mxu1  ;;  %v2072_v3 = vpop.f32.mrb[46].mxu0  ;;  %v1409_v4 = vpack.c.bf16 %v1313_v57, %v1310_v56 }
 0x156   : > { %v2135_v5 = vadd.f32 %v2134_v2, %v2133_v60  ;;  %v2136_v6 = vpop.f32.mrb[46].mxu1  ;;  %v2073_v7 = vpop.f32.mrb[47].mxu0 }
 0x157   : > { %v1221_v47 = vadd.f32 %v2071_v1, %v2752_v61  ;;  %v2074_v8 = vadd.f32 %v2073_v7, %v2072_v3  ;;  %v2137_v9 = vpop.f32.mrb[47].mxu1  ;;  %2199 = vmatprep.mubr.bf16.mxu0 %v1409_v4 }
 0x158   : > { %v2138_v10 = vadd.f32 %v2137_v9, %v2136_v6 }
 0x159   : > { %v1318_v12 = vadd.f32 %v2135_v5, %v1221_v47  ;;  %v1224_v49 = vadd.f32 %v2074_v8, %v2754_v63 }
 0x15b   : > { %v1321_v14 = vadd.f32 %v2138_v10, %v1224_v49  ;;  %v2075_v15 = vpop.f32.mrb[48].mxu0 }
 0x15c   : > { %v2139_v16 = vpop.f32.mrb[48].mxu1  ;;  %v2076_v17 = vpop.f32.mrb[49].mxu0 }
 0x15d   : > { %v2077_v18 = vadd.f32 %v2076_v17, %v2075_v15  ;;  %v2140_v20 = vpop.f32.mrb[49].mxu1  ;;  %v2078_v22 = vpop.f32.mrb[50].mxu0  ;;  %v1410_v23 = vpack.c.bf16 %v1321_v14, %v1318_v12 }
 0x15e   : > { %v2141_v24 = vadd.f32 %v2140_v20, %v2139_v16  ;;  %v2142_v25 = vpop.f32.mrb[50].mxu1  ;;  %v2079_v26 = vpop.f32.mrb[51].mxu0 }
 0x15f   : > { %v1229_v61 = vadd.f32 %v2077_v18, %v2756_v11  ;;  %v2080_v28 = vadd.f32 %v2079_v26, %v2078_v22  ;;  %v2143_v30 = vpop.f32.mrb[51].mxu1  ;;  %2200 = vmatmul.mubr.bf16.gmra.mrb[68].mxu0 %v1410_v23 }
 0x160   : > { %v2144_v31 = vadd.f32 %v2143_v30, %v2142_v25 }
 0x161   : > { %v1326_v32 = vadd.f32 %v2141_v24, %v1229_v61  ;;  %v1232_v63 = vadd.f32 %v2080_v28, %v2758_v13 }
 0x163   : > { %v1329_v19 = vadd.f32 %v2144_v31, %v1232_v63  ;;  %v2081_v34 = vpop.f32.mrb[52].mxu0 }
 0x164   : > { %v2145_v36 = vpop.f32.mrb[52].mxu1  ;;  %v2082_v37 = vpop.f32.mrb[53].mxu0 }
 0x165   : > { %v2083_v21 = vadd.f32 %v2082_v37, %v2081_v34  ;;  %v2146_v38 = vpop.f32.mrb[53].mxu1  ;;  %v2084_v39 = vpop.f32.mrb[54].mxu0  ;;  %v1411_v40 = vpack.c.bf16 %v1329_v19, %v1326_v32 }
 0x166   : > { %v2147_v41 = vadd.f32 %v2146_v38, %v2145_v36  ;;  %v2148_v42 = vpop.f32.mrb[54].mxu1  ;;  %v2085_v44 = vpop.f32.mrb[55].mxu0 }
 0x167   : > { %v1237_v11 = vadd.f32 %v2083_v21, %v2760_v27  ;;  %v2086_v46 = vadd.f32 %v2085_v44, %v2084_v39  ;;  %v2149_v48 = vpop.f32.mrb[55].mxu1  ;;  %2203 = vmatprep.mubr.bf16.mxu1 %v1411_v40 }
 0x168   : > { %v2150_v50 = vadd.f32 %v2149_v48, %v2148_v42 }
 0x169   : > { %v1334_v51 = vadd.f32 %v2147_v41, %v1237_v11  ;;  %v1240_v13 = vadd.f32 %v2086_v46, %v2762_v29 }
 0x16b   : > { %v1337_v52 = vadd.f32 %v2150_v50, %v1240_v13  ;;  %v2087_v33 = vpop.f32.mrb[56].mxu0 }
 0x16c   : > { %v2151_v53 = vpop.f32.mrb[56].mxu1  ;;  %v2088_v54 = vpop.f32.mrb[57].mxu0 }
 0x16d   : > { %v1412_v55 = vpack.c.bf16 %v1337_v52, %v1334_v51  ;;  %v2089_v56 = vadd.f32 %v2088_v54, %v2087_v33  ;;  %v2152_v35 = vpop.f32.mrb[57].mxu1  ;;  %v2090_v57 = vpop.f32.mrb[58].mxu0 }
 0x16e   : > { %v2153_v58 = vadd.f32 %v2152_v35, %v2151_v53  ;;  %v2154_v60 = vpop.f32.mrb[58].mxu1  ;;  %v2091_v0 = vpop.f32.mrb[59].mxu0 }
 0x16f   : > { %v1245_v27 = vadd.f32 %v2089_v56, %v2764_v43  ;;  %v2092_v1 = vadd.f32 %v2091_v0, %v2090_v57  ;;  %v2155_v2 = vpop.f32.mrb[59].mxu1  ;;  %2204 = vmatmul.mubr.bf16.vlgmr.msra.gmra.mrb[64].mxu1 %v1412_v55 }
 0x170   : > { %v2156_v3 = vadd.f32 %v2155_v2, %v2154_v60 }
 0x171   : > { %v1342_v4 = vadd.f32 %v2153_v58, %v1245_v27  ;;  %v1248_v29 = vadd.f32 %v2092_v1, %v2766_v45 }
 0x173   : > { %v1345_v5 = vadd.f32 %v2156_v3, %v1248_v29  ;;  %v2093_v6 = vpop.f32.mrb[60].mxu0 }
 0x174   : > { %v2157_v7 = vpop.f32.mrb[60].mxu1  ;;  %v2094_v47 = vpop.f32.mrb[61].mxu0 }
 0x175   : > { %v2095_v8 = vadd.f32 %v2094_v47, %v2093_v6  ;;  %v2158_v9 = vpop.f32.mrb[61].mxu1  ;;  %v2096_v10 = vpop.f32.mrb[62].mxu0  ;;  %v1413_v12 = vpack.c.bf16 %v1345_v5, %v1342_v4 }
 0x176   : > { %v2159_v49 = vadd.f32 %v2158_v9, %v2157_v7  ;;  %v2160_v14 = vpop.f32.mrb[62].mxu1  ;;  %v2097_v15 = vpop.f32.mrb[63].mxu0 }
 0x177   : > { %v1253_v43 = vadd.f32 %v2095_v8, %v2768_v59  ;;  %v2098_v16 = vadd.f32 %v2097_v15, %v2096_v10  ;;  %v2161_v17 = vpop.f32.mrb[63].mxu1  ;;  %2207 = vmatprep.mubr.bf16.mxu1 %v1413_v12 }
 0x178   : > { %v2162_v18 = vadd.f32 %v2161_v17, %v2160_v14 }
 0x179   : > { %v1350_v20 = vadd.f32 %v2159_v49, %v1253_v43  ;;  %v1256_v45 = vadd.f32 %v2098_v16, %v2770_v62 }
 0x17b   : > { %v1353_v22 = vadd.f32 %v2162_v18, %v1256_v45 }
 0x17d   : > { %v1414_v23 = vpack.c.bf16 %v1353_v22, %v1350_v20 }
 0x17f   : > { %2208 = vmatmul.mubr.bf16.gmra.mrb[68].mxu1 %v1414_v23 }
 0x222   : > { %v2197_v24 = vpop.f32.mrb[64].mxu0 }
 0x223   : > { %v1513_v25 = vpop.f32.mrb[65].mxu0 }
 0x224   : > { %v2198_v26 = vpop.f32.mrb[66].mxu0 }
 0x225   : > { %v1868_v61 = vpack.c.bf16 %v2198_v26, %v2197_v24  ;;  %v1516_v59 = vpop.f32.mrb[67].mxu0 }
 0x226   : > { %v1863_v28 = vpack.c.bf16 %v1516_v59, %v1513_v25 }
 0x227   : > { %1900 = vst [vmem:[%s225_s5 + $0x8] sm:$0xff] %v1868_v61  }
 0x228   : > { %1864 = vst [vmem:[%s225_s5] sm:$0xff] %v1863_v28  }
 0x232   : > { %v2201_v30 = vpop.f32.mrb[68].mxu0 }
 0x233   : > { %v1529_v31 = vpop.f32.mrb[69].mxu0 }
 0x234   : > { %v2202_v32 = vpop.f32.mrb[70].mxu0 }
 0x235   : > { %v1878_v62 = vpack.c.bf16 %v2202_v32, %v2201_v30  ;;  %v1532_v63 = vpop.f32.mrb[71].mxu0 }
 0x236   : > { %v1873_v19 = vpack.c.bf16 %v1532_v63, %v1529_v31 }
 0x237   : > { %1902 = vst [vmem:[%s225_s5 + $0x18] sm:$0xff] %v1878_v62  }
 0x238   : > { %1901 = vst [vmem:[%s225_s5 + $0x10] sm:$0xff] %v1873_v19  }
 0x242   : > { %v2205_v34 = vpop.f32.mrb[64].mxu1 }
 0x243   : > { %v1545_v36 = vpop.f32.mrb[65].mxu1 }
 0x244   : > { %v2206_v37 = vpop.f32.mrb[66].mxu1 }
 0x245   : > { %v1888_v21 = vpack.c.bf16 %v2206_v37, %v2205_v34  ;;  %v1548_v38 = vpop.f32.mrb[67].mxu1 }
 0x246   : > { %v1883_v39 = vpack.c.bf16 %v1548_v38, %v1545_v36 }
 0x247   : > { %1904 = vst [vmem:[%s225_s5 + $0x28] sm:$0xff] %v1888_v21  }
 0x248   : > { %1903 = vst [vmem:[%s225_s5 + $0x20] sm:$0xff] %v1883_v39  }
 0x252   : > { %v2209_v40 = vpop.f32.mrb[68].mxu1 }
 0x253   : > { %v1561_v41 = vpop.f32.mrb[69].mxu1 }
 0x254   : > { %v2210_v42 = vpop.f32.mrb[70].mxu1 }
 0x255   : > { %v1898_v44 = vpack.c.bf16 %v2210_v42, %v2209_v40  ;;  %v1564_v11 = vpop.f32.mrb[71].mxu1 }
 0x256   : > { %v1893_v46 = vpack.c.bf16 %v1564_v11, %v1561_v41 }
 0x257   : > { %1906 = vst [vmem:[%s225_s5 + $0x38] sm:$0xff] %v1898_v44  }
 0x258   : > { %1905 = vst [vmem:[%s225_s5 + $0x30] sm:$0xff] %v1893_v46  }
 0x259 PF: > { %s13_s14 = sadd.s32 1, %s2345_s14   ;;  %s2805_s12 = smov %s2341_s13 }
 0x25a   : > { %p10_p5 = scmp.ge.s32.totalorder %s13_s14, 4   ;;  %s2806_s13 = smov %s2808_s15 }
 0x25c   :  { %12 = sbr.rel (!%p10_p5) target bundleno = 2 (0x2), region = 73 }

</bundles_post_ra>
